<compile_context>
chip_gen: v5e
topology: v5e:2x2
jax: 0.10.0
libtpu: 0.0.40
codegen_flags: <defaults>
</compile_context>

<pallas_src>
import jax
import jax.numpy as jnp
from jax.experimental import pallas as pl
from jax.experimental.pallas import tpu as pltpu


def grb_kernel(x_ref, wa_ref, ba_ref, wb_ref, bb_ref, o_ref):
    # x_ref block: (nb, C, thw) f32 — lane dim is spatial (multiple of 128).
    wa = wa_ref[...]                                   # (C, C) bf16, resident
    ba = ba_ref[...]                                   # (C, 1) f32
    wb = wb_ref[...]                                   # (C, C) bf16, resident
    bb = bb_ref[...]                                   # (C, 1) f32

    nb = x_ref.shape[0]
    for i in range(nb):                                # static unroll; nb is small
        x_f32 = x_ref[i]                               # (C, thw) f32 (residual path)
        x_bf = x_f32.astype(jnp.bfloat16)              # matmul operand only

        # fused first conv of both paths: (C,C) @ (C,thw) on the MXU (f32 acc)
        h = jnp.dot(wa, x_bf, preferred_element_type=jnp.float32)
        h = jnp.maximum(h + ba, 0.0)                   # bias + ReLU in f32

        # fused second conv of both paths (p1 + p2 via concat along the K dim)
        p = jnp.dot(wb, h.astype(jnp.bfloat16), preferred_element_type=jnp.float32)
        p = p + bb

        # residual with full-precision x + output ReLU, f32 store
        o_ref[i] = jnp.maximum(x_f32 + p, 0.0)


def fold_bn(w, b, gamma, beta, mean, var, eps=1e-5):
    """Fold inference-mode BatchNorm into a (Cin, Cout) weight + (Cout,) bias."""
    scale = gamma / jnp.sqrt(var + eps)                # (Cout,)
    w_eff = w * scale[None, :]                         # scale each output channel
    b_eff = (b - mean) * scale + beta
    return w_eff.astype(jnp.float32), b_eff.astype(jnp.float32)


def _largest_tile(hwp, cap):
    """Largest multiple of 128 <= cap that divides hwp (hwp is a multiple of 128)."""
    cap = max(128, min(cap, hwp))
    t = cap - (cap % 128)
    while t > 128 and hwp % t != 0:
        t -= 128
    return t


@jax.jit
def grb_forward(x_nchw, params):
    N, C, H, W = x_nchw.shape
    HW = H * W

    (w1a, b1a, w1b, b1b, w2a, b2a, w2b, b2b) = params   # each w_* is (Cin, Cout)

    # Fuse the two paths' weights (tiny one-time wrapper cost).
    wa = jnp.concatenate([w1a, w2a], axis=1).T.astype(jnp.bfloat16)        # (C, C)
    ba = jnp.concatenate([b1a, b2a], axis=0).reshape(C, 1).astype(jnp.float32)
    wb = jnp.concatenate([w1b, w2b], axis=0).T.astype(jnp.bfloat16)        # (C, C)
    bb = (b1b + b2b).reshape(C, 1).astype(jnp.float32)

    # NCHW + 1x1 convs => per-image (C, HW) matmuls; keep x f32 (no cast pass).
    x3 = x_nchw.reshape(N, C, HW)

    # Lane-dense spatial tiling: HWp is the 128-rounded HW; the tile divides HWp,
    # so padding (and the trailing slice) only exists for ragged HW (<=127 cols).
    HWp = 128 * pl.cdiv(HW, 128)
    if HWp != HW:
        x3 = jnp.pad(x3, ((0, 0), (0, 0), (0, HWp - HW)))

    thw = _largest_tile(HWp, 2048)
    # v7x has two TensorCores: keep >= 2 parallel grid tiles when possible.
    if N * (HWp // thw) < 2 and thw > 128:
        thw = _largest_tile(HWp, thw // 2)
    hw_tiles = HWp // thw

    # Batch images per grid step when tiles are tiny (amortize ~0.35 us/step),
    # while keeping >= 2 grid tiles (v7x) and a modest per-step x footprint.
    nb = 1
    for cand in range(2, N + 1):
        if N % cand:
            continue
        if (N // cand) * hw_tiles < 2:
            break
        if cand * C * thw * 4 > (2 << 20):
            break
        nb = cand

    grid = (N // nb, hw_tiles)

    # Advisory cost hint for the XLA scheduler.
    flops = 4 * N * HWp * C * C                        # two (C,C)@(C,thw) matmuls
    bytes_accessed = (4 * N * HWp * C                  # f32 input
                      + 4 * N * HWp * C                # f32 output
                      + 2 * (2 * C * C) + 2 * (4 * C))   # bf16 weights + f32 biases

    out3 = pl.pallas_call(
        grb_kernel,
        out_shape=jax.ShapeDtypeStruct((N, C, HWp), jnp.float32),
        grid_spec=pltpu.PrefetchScalarGridSpec(
            num_scalar_prefetch=0,
            grid=grid,
            in_specs=[
                pl.BlockSpec((nb, C, thw), lambda n, j: (n, 0, j)),   # x tile
                pl.BlockSpec((C, C), lambda n, j: (0, 0)),            # fused Wa
                pl.BlockSpec((C, 1), lambda n, j: (0, 0)),            # fused ba
                pl.BlockSpec((C, C), lambda n, j: (0, 0)),            # fused Wb
                pl.BlockSpec((C, 1), lambda n, j: (0, 0)),            # fused bb
            ],
            out_specs=pl.BlockSpec((nb, C, thw), lambda n, j: (n, 0, j)),
        ),
        compiler_params=pltpu.CompilerParams(
            dimension_semantics=("parallel", "parallel")),
        cost_estimate=pl.CostEstimate(
            flops=flops, transcendentals=0, bytes_accessed=bytes_accessed),
    )(x3, wa, ba, wb, bb)

    if HWp != HW:
        out3 = out3[:, :, :HW]
    return out3.reshape(N, C, H, W)


def init_params(key, channel):
    """Deterministic init of conv + BN params, BN pre-folded into weights."""
    ch2 = channel // 2
    keys = jax.random.split(key, 16)

    def conv_w(k, cin, cout):
        # PyTorch Conv2d weight (cout, cin, 1, 1) -> stored here as (cin, cout)
        return (0.1 * jax.random.normal(k, (cin, cout))).astype(jnp.float32)

    def bn(kg, kb, km, kv, c):
        gamma = 1.0 + 0.05 * jax.random.normal(kg, (c,))
        beta = 0.05 * jax.random.normal(kb, (c,))
        mean = 0.05 * jax.random.normal(km, (c,))
        var = jnp.abs(0.5 + 0.1 * jax.random.normal(kv, (c,)))
        return gamma, beta, mean, var

    params = []
    kidx = 0
    for cin, cout in [(channel, ch2), (ch2, channel),   # path1
                      (channel, ch2), (ch2, channel)]:  # path2
        w = conv_w(keys[kidx], cin, cout)
        b = jnp.zeros((cout,), jnp.float32)  # conv bias=False when followed by BN
        g, be, m, v = bn(keys[kidx + 1], keys[kidx + 2], keys[kidx + 3],
                         jax.random.fold_in(keys[kidx + 3], 7), cout)
        w_eff, b_eff = fold_bn(w, b, g, be, m, v)
        params.extend([w_eff, b_eff])
        kidx += 4
    return tuple(params)


def grb_reference(x_nchw, params):
    """Pure-JAX f32 reference (same math as the PyTorch module, no Pallas)."""
    N, C, H, W = x_nchw.shape
    x2d = jnp.transpose(x_nchw, (0, 2, 3, 1)).reshape(-1, C)
    w1a, b1a, w1b, b1b, w2a, b2a, w2b, b2b = params
    p1 = jnp.maximum(x2d @ w1a + b1a, 0.0) @ w1b + b1b
    p2 = jnp.maximum(x2d @ w2a + b2a, 0.0) @ w2b + b2b
    out = jnp.maximum(x2d + p1 + p2, 0.0)
    return jnp.transpose(out.reshape(N, H, W, C), (0, 3, 1, 2))


if __name__ == "__main__":
    key = jax.random.PRNGKey(0)
    k_x, k_p = jax.random.split(key)

    N, C, H, W = 2, 4, 16, 16          # channel=4; dilation irrelevant for 1x1 convs
    x = jax.random.normal(k_x, (N, C, H, W), dtype=jnp.float32)
    params = init_params(k_p, C)

    # TODO(synk): training-mode BatchNorm (batch statistics) is not implemented;
    # inference-mode running stats are folded into the conv weights/biases.
    out = grb_forward(x, params)
    out = jax.block_until_ready(out)

    ref = grb_reference(x, params)
    assert out.shape == (N, C, H, W)
    # bf16 matmul operands vs pure-f32 reference (residual path is exact f32).
    assert jnp.allclose(out, ref, atol=1e-2, rtol=1e-2), "mismatch vs reference"

    print("KERNEL_OK")
</pallas_src>

<mosaic_0001>
module attributes {stable_mosaic.version = 11 : i64} {
  func.func @grb_kernel(%arg0: i32, %arg1: i32, %arg2: memref<1x4x256xf32, #tpu.memory_space<vmem>>, %arg3: memref<4x4xbf16, #tpu.memory_space<vmem>>, %arg4: memref<4x1xf32, #tpu.memory_space<vmem>>, %arg5: memref<4x4xbf16, #tpu.memory_space<vmem>>, %arg6: memref<4x1xf32, #tpu.memory_space<vmem>>, %arg7: memref<1x4x256xf32, #tpu.memory_space<vmem>>) attributes {dimension_semantics = [#tpu.dimension_semantics<parallel>, #tpu.dimension_semantics<parallel>], iteration_bounds = array<i64: 2, 1>, scalar_prefetch = 0 : i64, scratch_operands = 0 : i64, tpu.core_type = #tpu.core_type<tc>, window_params = [{transform_indices = @transform_0, window_bounds = array<i64: 1, 4, 256>}, {pipeline_mode = #tpu.pipeline_mode<synchronous>, transform_indices = @transform_1, window_bounds = array<i64: 4, 4>}, {pipeline_mode = #tpu.pipeline_mode<synchronous>, transform_indices = @transform_2, window_bounds = array<i64: 4, 1>}, {pipeline_mode = #tpu.pipeline_mode<synchronous>, transform_indices = @transform_3, window_bounds = array<i64: 4, 4>}, {pipeline_mode = #tpu.pipeline_mode<synchronous>, transform_indices = @transform_4, window_bounds = array<i64: 4, 1>}, {transform_indices = @transform_5, window_bounds = array<i64: 1, 4, 256>}]} {
    %c0 = arith.constant 0 : index
    %c0_0 = arith.constant 0 : index
    %0 = vector.load %arg3[%c0, %c0_0] : memref<4x4xbf16, #tpu.memory_space<vmem>>, vector<4x4xbf16>
    %c0_1 = arith.constant 0 : index
    %c0_2 = arith.constant 0 : index
    %1 = vector.load %arg4[%c0_1, %c0_2] : memref<4x1xf32, #tpu.memory_space<vmem>>, vector<4x1xf32>
    %c0_3 = arith.constant 0 : index
    %c0_4 = arith.constant 0 : index
    %2 = vector.load %arg5[%c0_3, %c0_4] : memref<4x4xbf16, #tpu.memory_space<vmem>>, vector<4x4xbf16>
    %c0_5 = arith.constant 0 : index
    %c0_6 = arith.constant 0 : index
    %3 = vector.load %arg6[%c0_5, %c0_6] : memref<4x1xf32, #tpu.memory_space<vmem>>, vector<4x1xf32>
    %c0_7 = arith.constant 0 : index
    %c0_8 = arith.constant 0 : index
    %c0_9 = arith.constant 0 : index
    %4 = vector.load %arg2[%c0_7, %c0_8, %c0_9] : memref<1x4x256xf32, #tpu.memory_space<vmem>>, vector<1x4x256xf32>
    %5 = vector.shape_cast %4 : vector<1x4x256xf32> to vector<4x256xf32>
    %6 = arith.truncf %5 : vector<4x256xf32> to vector<4x256xbf16>
    %cst = arith.constant dense<0.000000e+00> : vector<4x256xf32>
    %7 = tpu.matmul %0, %6, %cst {dimension_numbers = #tpu.dot_dimension_numbers<[1], [0], [0], [1], [0, 0, 1, 1], [], []>} : vector<4x4xbf16>, vector<4x256xbf16>, vector<4x256xf32> -> vector<4x256xf32>
    %8 = vector.broadcast %1 : vector<4x1xf32> to vector<4x256xf32>
    %9 = arith.addf %7, %8 : vector<4x256xf32>
    %cst_10 = arith.constant 0.000000e+00 : f32
    %10 = vector.broadcast %cst_10 : f32 to vector<4x256xf32>
    %11 = arith.maximumf %9, %10 : vector<4x256xf32>
    %12 = arith.truncf %11 : vector<4x256xf32> to vector<4x256xbf16>
    %cst_11 = arith.constant dense<0.000000e+00> : vector<4x256xf32>
    %13 = tpu.matmul %2, %12, %cst_11 {dimension_numbers = #tpu.dot_dimension_numbers<[1], [0], [0], [1], [0, 0, 1, 1], [], []>} : vector<4x4xbf16>, vector<4x256xbf16>, vector<4x256xf32> -> vector<4x256xf32>
    %14 = vector.broadcast %3 : vector<4x1xf32> to vector<4x256xf32>
    %15 = arith.addf %13, %14 : vector<4x256xf32>
    %16 = arith.addf %5, %15 : vector<4x256xf32>
    %cst_12 = arith.constant 0.000000e+00 : f32
    %17 = vector.broadcast %cst_12 : f32 to vector<4x256xf32>
    %18 = arith.maximumf %16, %17 : vector<4x256xf32>
    %c0_13 = arith.constant 0 : index
    %c0_14 = arith.constant 0 : index
    %c0_15 = arith.constant 0 : index
    %19 = vector.load %arg7[%c0_13, %c0_14, %c0_15] : memref<1x4x256xf32, #tpu.memory_space<vmem>>, vector<1x4x256xf32>
    %20 = vector.shape_cast %19 : vector<1x4x256xf32> to vector<4x256xf32>
    %21 = vector.shape_cast %18 : vector<4x256xf32> to vector<1x4x256xf32>
    tpu.vector_store %arg7[%c0_13, %c0_14, %c0_15], %21 {strides = array<i32>} : memref<1x4x256xf32, #tpu.memory_space<vmem>>, vector<1x4x256xf32>,
    return
  }
  func.func @transform_0(%arg0: i32, %arg1: i32) -> (i32, i32, i32) {
    %c0_i32 = arith.constant 0 : i32
    %c0_i32_0 = arith.constant 0 : i32
    return %arg0, %c0_i32, %arg1 : i32, i32, i32
  }
  func.func @transform_1(%arg0: i32, %arg1: i32) -> (i32, i32) {
    %c0_i32 = arith.constant 0 : i32
    %c0_i32_0 = arith.constant 0 : i32
    %c0_i32_1 = arith.constant 0 : i32
    return %c0_i32, %c0_i32_0 : i32, i32
  }
  func.func @transform_2(%arg0: i32, %arg1: i32) -> (i32, i32) {
    %c0_i32 = arith.constant 0 : i32
    %c0_i32_0 = arith.constant 0 : i32
    %c0_i32_1 = arith.constant 0 : i32
    return %c0_i32, %c0_i32_0 : i32, i32
  }
  func.func @transform_3(%arg0: i32, %arg1: i32) -> (i32, i32) {
    %c0_i32 = arith.constant 0 : i32
    %c0_i32_0 = arith.constant 0 : i32
    %c0_i32_1 = arith.constant 0 : i32
    return %c0_i32, %c0_i32_0 : i32, i32
  }
  func.func @transform_4(%arg0: i32, %arg1: i32) -> (i32, i32) {
    %c0_i32 = arith.constant 0 : i32
    %c0_i32_0 = arith.constant 0 : i32
    %c0_i32_1 = arith.constant 0 : i32
    return %c0_i32, %c0_i32_0 : i32, i32
  }
  func.func @transform_5(%arg0: i32, %arg1: i32) -> (i32, i32, i32) {
    %c0_i32 = arith.constant 0 : i32
    %c0_i32_0 = arith.constant 0 : i32
    return %arg0, %c0_i32, %arg1 : i32, i32, i32
  }
}

</mosaic_0001>

<bundles_post_ra>
// kernel: grb_forward.1
= control target key start
LH: loop header
LB: loop body
LE: loop exit
PB: predicated region body
PF: predicated region fallthrough
CT: control target
= control target key end

     0   :  { %s558_s18 = smov 0   ;;  %s560_s19 = smov 0   ;;  %s618_s0 = inlined_call_operand.vmem [shape: f32[2,4,256], index: 0, kind: input, shape index: {}]   ;;  %s619_s1 = inlined_call_operand.vmem [shape: bf16[4,4], index: 1, kind: input, shape index: {}]   ;;  %s620_s2 = inlined_call_operand.vmem [shape: f32[4,1], index: 2, kind: input, shape index: {}]   ;;  %s621_s3 = inlined_call_operand.vmem [shape: bf16[4,4], index: 3, kind: input, shape index: {}]   ;;  %s622_s4 = inlined_call_operand.vmem [shape: f32[4,1], index: 4, kind: input, shape index: {}]   ;;  %s623_s5 = inlined_call_operand.vmem [shape: f32[2,4,256], index: 5, kind: output, shape index: {}]  }
   0x1   :  { %s562_s20 = smov 0  }
   0x2 LB: > { %s27_s21 = sadd.s32 1, %s521_s19  ;;  %p464_p0 = scmp.ge.s32.totalorder %s525_s20, 1  ;;  %s525_s20 = sphi %s562_s20, %s15_s20   ;;  %s521_s19 = sphi %s560_s19, %s625_s19   ;;  %s517_s18 = sphi %s558_s18, %s624_s18  }
   0x3   : > { %p29_p1 = scmp.ge.s32.totalorder %s27_s21, 2  ;;  %p208_p2 = scmp.lt.s32.totalorder %s525_s20, 3 }
   0x5   : > { %s627_s21 = smov (%p29_p1, %s27_s21), 0  ;;  %p209_p3 = pnand %p464_p0, %p208_p2 }
   0x6   : > { %p245_p4 = scmp.lt.s32.totalorder (!%p209_p3), %s517_s18, 1 }
   0x7   : > { %212 = sbr.rel (%p209_p3) target bundleno = 308 (0x134), region = 40 }
   0xc   : > { %v527_v0 = vmov 0   ;;  %v266_v1 = vld [vmem:[%s620_s2] sm:$0xf]  ;;  %s629_s18 = smov (!%p245_p4, %s517_s18), 1  ;;  %vm287_vm0 = vcmask 1041408   ;;  %vm283_vm1 = vcmask 31744  }
   0xd   : > { %502 = vset.pattern.permute.xlu0 %v527_v0  ;;  %s475_s24 = sshll.u32 %s629_s18, 3  ;;  %v268_v3 = vld [vmem:[%s622_s4] sm:$0xf]  ;;  %vm367_vm2 = vcmask 1043456  }
   0xe   : > { %280 = vperm.xlu0 %502, %v266_v1   ;;  %s252_s27 = scalar_lea.vmem %s618_s0, %s475_s24  ;;  %v265_v10 = vld [vmem:[%s619_s1] sm:$0x3]  ;;  %s262_s11 = scalar_lea.vmem %s623_s5, %s475_s24 }
   0xf   : > { %v269_v2 = vld [vmem:[%s252_s27] sm:$0xff] }
  0x10   : > { %271 = vst [vmem:[#allocation1] ss:$2 sm:$0xff] %v269_v2  ;;  %v267_v24 = vld [vmem:[%s621_s3] sm:$0x3] }
  0x16   : > { %326 = vperm.xlu0 %502, %v268_v3  }
  0x17   : > { %v272_v4 = vld.sshfl [vmem:[#allocation1] sm:$0xff pattern:$0x75316420]  ;;  %v273_v5 = vld.sshfl [vmem:[#allocation1 + $0x8] sm:$0xff pattern:$0x75316420] }
  0x18   : > { %v276_v6 = vpack.c.bf16 %v272_v4, %v272_v4  ;;  %v277_v7 = vpack.c.bf16 %v273_v5, %v273_v5 }
  0x1a   : > { %v289_v8 = vsel %vm287_vm0, %v276_v6, 0  ;;  %v292_v9 = vsel %vm287_vm0, %v277_v7, 0 }
  0x1b   : > { %301 = vmatpush.bf16.msra.mxu0 %v289_v8  ;;  %314 = vmatpush.bf16.msra.mxu1 %v292_v9 }
  0x1e   : > { %469 = vmatmul.msk.bf16.vlgmr.msra.gmra.mxu0 %vm283_vm1, %v265_v10  ;;  %470 = vmatmul.msk.bf16.vlgmr.msra.gmra.mxu1 %vm283_vm1, %v265_v10 }
  0x80   : > { %v281_v11 = vpop.permute.xlu0 %280 }
  0x88   : > { %v327_v25 = vpop.permute.xlu0 %326 }
  0x9b   : > { %v303_v12 = vpop.f32.mrf.mxu0  ;;  %v316_v13 = vpop.f32.mrf.mxu1 }
  0x9c   : > { %v304_v14 = vadd.f32 %v303_v12, %v281_v11  ;;  %v317_v15 = vadd.f32 %v316_v13, %v281_v11 }
  0x9e   : > { %v320_v16 = vmax.f32 %v304_v14, 0.0  ;;  %v321_v17 = vmax.f32 %v317_v15, 0.0 }
  0xa0   : > { %v322_v18 = vpack.c.bf16 %v320_v16, %v320_v16  ;;  %v323_v19 = vpack.c.bf16 %v321_v17, %v321_v17 }
  0xa2   : > { %v333_v20 = vsel %vm287_vm0, %v322_v18, 0  ;;  %v336_v21 = vsel %vm287_vm0, %v323_v19, 0 }
  0xa3   : > { %v305_v22 = vpop.f32.mrf.mxu0  ;;  %v318_v23 = vpop.f32.mrf.mxu1  ;;  %345 = vmatpush.bf16.msra.mxu2 %v333_v20  ;;  %358 = vmatpush.bf16.msra.mxu3 %v336_v21 }
  0xa6   : > { %471 = vmatmul.msk.bf16.vlgmr.msra.gmra.mxu2 %vm283_vm1, %v267_v24  ;;  %472 = vmatmul.msk.bf16.vlgmr.msra.gmra.mxu3 %vm283_vm1, %v267_v24 }
 0x129   : > { %v347_v26 = vpop.f32.mrf.mxu2  ;;  %v360_v27 = vpop.f32.mrf.mxu3 }
 0x12a   : > { %v361_v28 = vadd.f32 %v360_v27, %v327_v25  ;;  %v348_v29 = vadd.f32 %v347_v26, %v327_v25 }
 0x12c   : > { %v366_v30 = vrot.slane %v361_v28, 4 }
 0x12e   : > { %v368_v31 = vsel %vm367_vm2, %v348_v29, %v366_v30 }
 0x12f   : > { %v370_v32 = vadd.f32 %v368_v31, %v269_v2 }
 0x131   : > { %v371_v33 = vmax.f32 %v370_v32, 0.0  ;;  %v349_v34 = vpop.f32.mrf.mxu2  ;;  %v362_v35 = vpop.f32.mrf.mxu3 }
 0x133   : > { %372 = vst [vmem:[%s262_s11] sm:$0xff] %v371_v33 }
 0x134 PF: > { %s15_s20 = sadd.s32 1, %s525_s20   ;;  %s624_s18 = smov %s521_s19 }
 0x135   : > { %p12_p5 = scmp.ge.s32.totalorder %s15_s20, 4   ;;  %s625_s19 = smov %s627_s21 }
 0x137   :  { %14 = sbr.rel (!%p12_p5) target bundleno = 2 (0x2), region = 70 }

</bundles_post_ra>
